<compile_context>
chip_gen: v7x
topology: tpu7x:2x2x1
jax: 0.10.0
libtpu: 0.0.40
codegen_flags: <defaults>
</compile_context>

<pallas_src>
import functools

import jax
import jax.numpy as jnp
from jax.experimental import pallas as pl
from jax.experimental.pallas import tpu as pltpu


# ----------------------------------------------------------------------------
# Fused Pallas kernel: one grid step = one block of B_tile batch elements.
# ----------------------------------------------------------------------------
def _fused_convlayer_kernel(xv_ref, w1_ref, b1_ref, mpool_ref,
                            w2_ref, b2_ref, mh2_ref, w3_ref, b3_ref, o_ref):
    """
    xv_ref   : (pool, Cin, VL)   bf16  phase-de-interleaved, zero-padded input
    w1_ref   : (C1, K1max*Cin)   bf16  fused 3-branch layer-1 weights (zero-embedded)
    b1_ref   : (C1, 1)           f32
    mpool_ref: (1, NC1)          f32   0/1 valid-column mask for the pooled activation
    w2_ref   : (C2, K2*C1)       bf16
    b2_ref   : (C2, 1)           f32
    mh2_ref  : (1, NC2)          f32   0/1 valid-column mask for conv_l2 output
    w3_ref   : (C3, K3*C2)       bf16
    b3_ref   : (C3, 1)           f32
    o_ref    : (C3, NCO)         f32   lane-dense output (batch-folded columns)
    """
    pool, cin, _ = xv_ref.shape
    c1 = w1_ref.shape[0]
    k1max = w1_ref.shape[1] // cin
    c2 = w2_ref.shape[0]
    k2 = w2_ref.shape[1] // c1
    k3 = w3_ref.shape[1] // c2
    nc1 = mpool_ref.shape[1]
    nc2 = mh2_ref.shape[1]
    nco = o_ref.shape[1]

    # Load the phase views once; everything else stays in registers / values.
    views = [xv_ref[q] for q in range(pool)]             # pool x (Cin, VL) bf16

    # ---- layer 1 (3 fused branches + concat) + MaxPool1d, phase-decomposed --
    # Layer-1 output position u = m*pool + p -> phase-p matmul column m.  The
    # pool stride never appears in-kernel (the wrapper de-interleaved x by
    # phase), so every im2col slab is a unit-stride lane slice and pooling is
    # an elementwise maximum over the `pool` phase matmuls.
    pooled = None
    for p in range(pool):                                 # static, small
        slabs = []
        for k in range(k1max):                            # static, small (16)
            q = (p + k) % pool
            d = (p + k) // pool
            slabs.append(views[q][:, d:d + nc1])
        col1 = jnp.concatenate(slabs, axis=0)             # (K1max*Cin, NC1) bf16
        z = jnp.dot(w1_ref[...], col1, preferred_element_type=jnp.float32)
        pooled = z if pooled is None else jnp.maximum(pooled, z)
    # Bias once (constant across phases), then zero non-valid columns so the
    # inter-batch gaps act as conv_l2's zero padding.
    pooled = (pooled + b1_ref[...]) * mpool_ref[...]      # (C1, NC1) f32
    pooled_b = pooled.astype(jnp.bfloat16)

    # ---- conv_l2: in-register im2col + one matmul ----------------------------
    col2 = jnp.concatenate([pooled_b[:, t:t + nc2] for t in range(k2)], axis=0)
    h2 = jnp.dot(w2_ref[...], col2, preferred_element_type=jnp.float32)
    h2 = (h2 + b2_ref[...]) * mh2_ref[...]                # (C2, NC2) f32
    h2_b = h2.astype(jnp.bfloat16)

    # ---- conv_l3 --------------------------------------------------------------
    col3 = jnp.concatenate([h2_b[:, t:t + nco] for t in range(k3)], axis=0)
    out = jnp.dot(w3_ref[...], col3, preferred_element_type=jnp.float32)
    out = out + b3_ref[...]

    o_ref[...] = out.astype(o_ref.dtype)                  # lane-dense store


# ----------------------------------------------------------------------------
# Wrapper: weight re-layout, batch folding, phase de-interleave, pallas_call.
# ----------------------------------------------------------------------------
def _flatten_conv_weight(w_oik):
    """(Cout, Cin, K) -> (Cout, K*Cin), k-major (matches im2col row order)."""
    cout, cin, k = w_oik.shape
    return jnp.transpose(w_oik, (0, 2, 1)).reshape(cout, k * cin)


def _embed_branch(w_oik, pad_b, maxpad, k1max):
    """Zero-embed one layer-1 branch's flat weights into the shared K depth."""
    cout, cin, kb = w_oik.shape
    off = maxpad - pad_b
    flat = _flatten_conv_weight(w_oik)
    left = jnp.zeros((cout, off * cin), flat.dtype)
    right = jnp.zeros((cout, (k1max - off - kb) * cin), flat.dtype)
    return jnp.concatenate([left, flat, right], axis=1)


# (weight key, bias key, kernel size, padding) for the three layer-1 branches
_L1_BRANCHES = (("w1_4", "b1_4", 4, 2),
                ("w1_8", "b1_8", 8, 4),
                ("w1_16", "b1_16", 16, 8))
_PAD2, _PAD3 = 2, 2            # paddings of conv_l2 / conv_l3
_MAX_BATCH_TILE = 32
_VMEM_BUDGET_BYTES = 24 * 1024 * 1024   # conservative vs. v7x's 64 MiB VMEM


def _round_up(x, m):
    return ((x + m - 1) // m) * m


@functools.partial(jax.jit, static_argnames=("max_pool_size",))
def conv_layer_forward(x_ncl, params, max_pool_size):
    """Full ConvLayer.forward. Input/output in PyTorch NCL layout."""
    n, cin, l = x_ncl.shape
    pool = int(max_pool_size)

    # ---- layer-1 geometry -----------------------------------------------------
    pads = [p for (_, _, _, p) in _L1_BRANCHES]
    ks = [k for (_, _, k, _) in _L1_BRANCHES]
    maxpad = max(pads)
    l1s = [l + 2 * p - k + 1 for k, p in zip(ks, pads)]
    assert len(set(l1s)) == 1, "layer-1 branches must share output length"
    l1 = l1s[0]
    k1max = max(maxpad - p + k for k, p in zip(ks, pads))
    lpad = l + 2 * maxpad

    w2, b2 = params["w2"], params["b2"]
    w3, b3 = params["w3"], params["b3"]
    c2, _, k2 = w2.shape
    c3, _, k3 = w3.shape
    c1 = sum(params[wn].shape[0] for (wn, _, _, _) in _L1_BRANCHES)

    lp = l1 // pool
    l2 = lp + 2 * _PAD2 - k2 + 1
    l3 = l2 + 2 * _PAD3 - k3 + 1

    # ---- flattened column layout ----------------------------------------------
    # Each batch element owns one period of P1 pooled-resolution columns; its
    # valid data sits at offset `delta` so the masked-to-zero gaps serve as the
    # zero padding of conv_l2 / conv_l3 between batch elements.
    delta = _PAD2 + _PAD3
    d_max = (pool - 1 + k1max - 1) // pool
    p1 = delta + max(pl.cdiv(lpad, pool), lp + max(d_max, _PAD2))
    p0 = pool * p1
    z_left = maxpad + pool * delta
    assert p0 >= z_left + l
    assert p1 >= l2 + 2 * _PAD3

    # ---- batch tiling (fold batch into lanes, keep grid >= 2, cap by VMEM) -----
    bytes_per_col = (2 * (k1max * cin + k2 * c1 + k3 * c2)   # bf16 im2cols
                     + 4 * (2 * c1 + 2 * c2 + c3) + 8)        # f32 activations
    cols_budget = max(p1, _VMEM_BUDGET_BYTES // max(bytes_per_col, 1))
    b_tile = max(1, min(_MAX_BATCH_TILE, cols_budget // p1, pl.cdiv(n, 2)))
    nblk = pl.cdiv(n, b_tile)
    n_pad = nblk * b_tile

    # Column counts per layer (output rounded up to a lane-dense multiple of 128).
    nco = _round_up(b_tile * p1, 128)
    nc2 = nco + k3 - 1
    nc1 = nc2 + k2 - 1
    vl = nc1 + d_max
    flat_len = pool * vl

    # ---- fused / flattened weights (bf16 operands, f32 biases) -----------------
    w1_big = jnp.concatenate(
        [_embed_branch(params[wn], p, maxpad, k1max)
         for (wn, _, _, p) in _L1_BRANCHES], axis=0).astype(jnp.bfloat16)
    b1_cat = jnp.concatenate(
        [params[bn] for (_, bn, _, _) in _L1_BRANCHES]).reshape(-1, 1)
    w2f = _flatten_conv_weight(w2).astype(jnp.bfloat16)
    w3f = _flatten_conv_weight(w3).astype(jnp.bfloat16)
    b2c = b2.reshape(-1, 1)
    b3c = b3.reshape(-1, 1)

    # ---- valid-column masks (replace in-kernel zero-init / padded scratch) -----
    cols1 = jnp.arange(nc1)
    m1 = ((cols1 % p1 >= delta) & (cols1 % p1 < delta + lp)
          & (cols1 < b_tile * p1)).astype(jnp.float32)[None, :]
    cols2 = jnp.arange(nc2)
    m2 = ((cols2 % p1 >= _PAD3) & (cols2 % p1 < _PAD3 + l2)
          & (cols2 < b_tile * p1)).astype(jnp.float32)[None, :]

    # ---- input re-layout: pad, fold batch into length, de-interleave phases ----
    # (all free XLA layout plumbing in HBM)
    xseg = jnp.pad(x_ncl, ((0, n_pad - n), (0, 0),
                           (z_left, p0 - z_left - l)))           # (n_pad, Cin, P0)
    xflat = xseg.reshape(nblk, b_tile, cin, p0).transpose(0, 2, 1, 3)
    xflat = xflat.reshape(nblk, cin, b_tile * p0)
    xflat = jnp.pad(xflat, ((0, 0), (0, 0), (0, flat_len - b_tile * p0)))
    xv = xflat.reshape(nblk, cin, vl, pool).transpose(0, 3, 1, 2)
    xv = xv.astype(jnp.bfloat16)                                 # (nblk, pool, Cin, VL)

    out = pl.pallas_call(
        _fused_convlayer_kernel,
        out_shape=jax.ShapeDtypeStruct((nblk, c3, nco), x_ncl.dtype),
        grid=(nblk,),
        in_specs=[
            pl.BlockSpec((None, pool, cin, vl), lambda i: (i, 0, 0, 0)),
            pl.BlockSpec((c1, k1max * cin), lambda i: (0, 0)),
            pl.BlockSpec((c1, 1), lambda i: (0, 0)),
            pl.BlockSpec((1, nc1), lambda i: (0, 0)),
            pl.BlockSpec((c2, k2 * c1), lambda i: (0, 0)),
            pl.BlockSpec((c2, 1), lambda i: (0, 0)),
            pl.BlockSpec((1, nc2), lambda i: (0, 0)),
            pl.BlockSpec((c3, k3 * c2), lambda i: (0, 0)),
            pl.BlockSpec((c3, 1), lambda i: (0, 0)),
        ],
        out_specs=pl.BlockSpec((None, c3, nco), lambda i: (i, 0, 0)),
        compiler_params=pltpu.CompilerParams(
            dimension_semantics=("parallel",),
            vmem_limit_bytes=32 * 1024 * 1024),
    )(xv, w1_big, b1_cat, m1, w2f, b2c, m2, w3f, b3c)

    # ---- un-fold the lane-dense output back to (N, C3, L3) ---------------------
    out = out[:, :, :b_tile * p1].reshape(nblk, c3, b_tile, p1)
    out = out.transpose(0, 2, 1, 3).reshape(n_pad, c3, p1)
    return out[:n, :, :l3]


# ----------------------------------------------------------------------------
# Pure-JAX reference (correctness check only)
# ----------------------------------------------------------------------------
def _ref_conv(x_ncl, w_oik, b, pad):
    y = jax.lax.conv_general_dilated(
        x_ncl, w_oik, window_strides=(1,), padding=[(pad, pad)],
        dimension_numbers=("NCH", "OIH", "NCH"))
    return y + b[None, :, None]


def ref_forward(x_ncl, params, pool):
    x4 = _ref_conv(x_ncl, params["w1_4"], params["b1_4"], 2)
    x8 = _ref_conv(x_ncl, params["w1_8"], params["b1_8"], 4)
    x16 = _ref_conv(x_ncl, params["w1_16"], params["b1_16"], 8)
    xc = jnp.concatenate([x4, x8, x16], axis=1)
    n, c, l = xc.shape
    lo = l // pool
    xm = jnp.max(xc[:, :, :lo * pool].reshape(n, c, lo, pool), axis=3)
    x2 = _ref_conv(xm, params["w2"], params["b2"], 2)
    x3 = _ref_conv(x2, params["w3"], params["b3"], 2)
    return x3


# ----------------------------------------------------------------------------
# Main
# ----------------------------------------------------------------------------
if __name__ == "__main__":
    # Module hyperparameters (small, synthetic)
    in_channels = 4
    out_channels_l1 = 8
    out_channels_l2 = 16
    out_channels_l3 = 8
    max_pool_size = 2

    batch, seq_len = 2, 16  # input x: (N, C_in, L) = (2, 4, 16)

    key = jax.random.PRNGKey(0)
    keys = jax.random.split(key, 12)

    def init_w(k, o, i, ks):
        return jax.random.normal(k, (o, i, ks), jnp.float32) * 0.1

    def init_b(k, o):
        return jax.random.normal(k, (o,), jnp.float32) * 0.1

    params = {
        "w1_4":  init_w(keys[0], out_channels_l1, in_channels, 4),
        "b1_4":  init_b(keys[1], out_channels_l1),
        "w1_8":  init_w(keys[2], out_channels_l1, in_channels, 8),
        "b1_8":  init_b(keys[3], out_channels_l1),
        "w1_16": init_w(keys[4], out_channels_l1, in_channels, 16),
        "b1_16": init_b(keys[5], out_channels_l1),
        "w2":    init_w(keys[6], out_channels_l2, 3 * out_channels_l1, 8),
        "b2":    init_b(keys[7], out_channels_l2),
        "w3":    init_w(keys[8], out_channels_l3, out_channels_l2, 4),
        "b3":    init_b(keys[9], out_channels_l3),
    }

    x = jax.random.normal(keys[10], (batch, in_channels, seq_len), jnp.float32)

    out = conv_layer_forward(x, params, max_pool_size=max_pool_size)
    out = jax.block_until_ready(out)

    ref = jax.block_until_ready(ref_forward(x, params, max_pool_size))

    assert out.shape == ref.shape, (out.shape, ref.shape)
    # bf16 matmul operands (f32 accumulation) -> slightly looser tolerance than
    # the pure-f32 XLA reference.
    assert jnp.allclose(out, ref, atol=6e-2, rtol=5e-2), (
        float(jnp.max(jnp.abs(out - ref))))

    print("KERNEL_OK")
</pallas_src>

<mosaic_0001>
module attributes {stable_mosaic.version = 11 : i64} {
  func.func @_fused_convlayer_kernel(%arg0: i32, %arg1: memref<1x2x4x146xbf16, #tpu.memory_space<vmem>>, %arg2: memref<24x64xbf16, #tpu.memory_space<vmem>>, %arg3: memref<24x1xf32, #tpu.memory_space<vmem>>, %arg4: memref<1x138xf32, #tpu.memory_space<vmem>>, %arg5: memref<16x192xbf16, #tpu.memory_space<vmem>>, %arg6: memref<16x1xf32, #tpu.memory_space<vmem>>, %arg7: memref<1x131xf32, #tpu.memory_space<vmem>>, %arg8: memref<8x64xbf16, #tpu.memory_space<vmem>>, %arg9: memref<8x1xf32, #tpu.memory_space<vmem>>, %arg10: memref<1x8x128xf32, #tpu.memory_space<vmem>>) attributes {dimension_semantics = [#tpu.dimension_semantics<parallel>], iteration_bounds = array<i64: 2>, scalar_prefetch = 0 : i64, scratch_operands = 0 : i64, tpu.core_type = #tpu.core_type<tc>, window_params = [{transform_indices = @transform_0, window_bounds = array<i64: 1, 2, 4, 146>}, {pipeline_mode = #tpu.pipeline_mode<synchronous>, transform_indices = @transform_1, window_bounds = array<i64: 24, 64>}, {pipeline_mode = #tpu.pipeline_mode<synchronous>, transform_indices = @transform_2, window_bounds = array<i64: 24, 1>}, {pipeline_mode = #tpu.pipeline_mode<synchronous>, transform_indices = @transform_3, window_bounds = array<i64: 1, 138>}, {pipeline_mode = #tpu.pipeline_mode<synchronous>, transform_indices = @transform_4, window_bounds = array<i64: 16, 192>}, {pipeline_mode = #tpu.pipeline_mode<synchronous>, transform_indices = @transform_5, window_bounds = array<i64: 16, 1>}, {pipeline_mode = #tpu.pipeline_mode<synchronous>, transform_indices = @transform_6, window_bounds = array<i64: 1, 131>}, {pipeline_mode = #tpu.pipeline_mode<synchronous>, transform_indices = @transform_7, window_bounds = array<i64: 8, 64>}, {pipeline_mode = #tpu.pipeline_mode<synchronous>, transform_indices = @transform_8, window_bounds = array<i64: 8, 1>}, {transform_indices = @transform_9, window_bounds = array<i64: 1, 8, 128>}]} {
    %c0 = arith.constant 0 : index
    %c0_0 = arith.constant 0 : index
    %c0_1 = arith.constant 0 : index
    %c0_2 = arith.constant 0 : index
    %0 = vector.load %arg1[%c0, %c0_0, %c0_1, %c0_2] : memref<1x2x4x146xbf16, #tpu.memory_space<vmem>>, vector<1x1x4x146xbf16>
    %1 = vector.shape_cast %0 : vector<1x1x4x146xbf16> to vector<4x146xbf16>
    %c0_3 = arith.constant 0 : index
    %c1 = arith.constant 1 : index
    %c0_4 = arith.constant 0 : index
    %c0_5 = arith.constant 0 : index
    %2 = vector.load %arg1[%c0_3, %c1, %c0_4, %c0_5] : memref<1x2x4x146xbf16, #tpu.memory_space<vmem>>, vector<1x1x4x146xbf16>
    %3 = vector.shape_cast %2 : vector<1x1x4x146xbf16> to vector<4x146xbf16>
    %4 = vector.extract_strided_slice %1 {offsets = [0, 0], sizes = [4, 138], strides = [1, 1]} : vector<4x146xbf16> to vector<4x138xbf16>
    %5 = vector.extract_strided_slice %3 {offsets = [0, 0], sizes = [4, 138], strides = [1, 1]} : vector<4x146xbf16> to vector<4x138xbf16>
    %6 = vector.extract_strided_slice %1 {offsets = [0, 1], sizes = [4, 138], strides = [1, 1]} : vector<4x146xbf16> to vector<4x138xbf16>
    %7 = vector.extract_strided_slice %3 {offsets = [0, 1], sizes = [4, 138], strides = [1, 1]} : vector<4x146xbf16> to vector<4x138xbf16>
    %8 = vector.extract_strided_slice %1 {offsets = [0, 2], sizes = [4, 138], strides = [1, 1]} : vector<4x146xbf16> to vector<4x138xbf16>
    %9 = vector.extract_strided_slice %3 {offsets = [0, 2], sizes = [4, 138], strides = [1, 1]} : vector<4x146xbf16> to vector<4x138xbf16>
    %10 = vector.extract_strided_slice %1 {offsets = [0, 3], sizes = [4, 138], strides = [1, 1]} : vector<4x146xbf16> to vector<4x138xbf16>
    %11 = vector.extract_strided_slice %3 {offsets = [0, 3], sizes = [4, 138], strides = [1, 1]} : vector<4x146xbf16> to vector<4x138xbf16>
    %12 = vector.extract_strided_slice %1 {offsets = [0, 4], sizes = [4, 138], strides = [1, 1]} : vector<4x146xbf16> to vector<4x138xbf16>
    %13 = vector.extract_strided_slice %3 {offsets = [0, 4], sizes = [4, 138], strides = [1, 1]} : vector<4x146xbf16> to vector<4x138xbf16>
    %14 = vector.extract_strided_slice %1 {offsets = [0, 5], sizes = [4, 138], strides = [1, 1]} : vector<4x146xbf16> to vector<4x138xbf16>
    %15 = vector.extract_strided_slice %3 {offsets = [0, 5], sizes = [4, 138], strides = [1, 1]} : vector<4x146xbf16> to vector<4x138xbf16>
    %16 = vector.extract_strided_slice %1 {offsets = [0, 6], sizes = [4, 138], strides = [1, 1]} : vector<4x146xbf16> to vector<4x138xbf16>
    %17 = vector.extract_strided_slice %3 {offsets = [0, 6], sizes = [4, 138], strides = [1, 1]} : vector<4x146xbf16> to vector<4x138xbf16>
    %18 = vector.extract_strided_slice %1 {offsets = [0, 7], sizes = [4, 138], strides = [1, 1]} : vector<4x146xbf16> to vector<4x138xbf16>
    %19 = vector.extract_strided_slice %3 {offsets = [0, 7], sizes = [4, 138], strides = [1, 1]} : vector<4x146xbf16> to vector<4x138xbf16>
    %20 = tpu.concatenate %4, %5, %6, %7, %8, %9, %10, %11, %12, %13, %14, %15, %16, %17, %18, %19 in 0 : vector<4x138xbf16>, vector<4x138xbf16>, vector<4x138xbf16>, vector<4x138xbf16>, vector<4x138xbf16>, vector<4x138xbf16>, vector<4x138xbf16>, vector<4x138xbf16>, vector<4x138xbf16>, vector<4x138xbf16>, vector<4x138xbf16>, vector<4x138xbf16>, vector<4x138xbf16>, vector<4x138xbf16>, vector<4x138xbf16>, vector<4x138xbf16> -> vector<64x138xbf16>
    %c0_6 = arith.constant 0 : index
    %c0_7 = arith.constant 0 : index
    %21 = vector.load %arg2[%c0_6, %c0_7] : memref<24x64xbf16, #tpu.memory_space<vmem>>, vector<24x64xbf16>
    %cst = arith.constant dense<0.000000e+00> : vector<24x138xf32>
    %22 = tpu.matmul %21, %20, %cst {dimension_numbers = #tpu.dot_dimension_numbers<[1], [0], [0], [1], [0, 0, 1, 1], [], []>} : vector<24x64xbf16>, vector<64x138xbf16>, vector<24x138xf32> -> vector<24x138xf32>
    %23 = vector.extract_strided_slice %3 {offsets = [0, 0], sizes = [4, 138], strides = [1, 1]} : vector<4x146xbf16> to vector<4x138xbf16>
    %24 = vector.extract_strided_slice %1 {offsets = [0, 1], sizes = [4, 138], strides = [1, 1]} : vector<4x146xbf16> to vector<4x138xbf16>
    %25 = vector.extract_strided_slice %3 {offsets = [0, 1], sizes = [4, 138], strides = [1, 1]} : vector<4x146xbf16> to vector<4x138xbf16>
    %26 = vector.extract_strided_slice %1 {offsets = [0, 2], sizes = [4, 138], strides = [1, 1]} : vector<4x146xbf16> to vector<4x138xbf16>
    %27 = vector.extract_strided_slice %3 {offsets = [0, 2], sizes = [4, 138], strides = [1, 1]} : vector<4x146xbf16> to vector<4x138xbf16>
    %28 = vector.extract_strided_slice %1 {offsets = [0, 3], sizes = [4, 138], strides = [1, 1]} : vector<4x146xbf16> to vector<4x138xbf16>
    %29 = vector.extract_strided_slice %3 {offsets = [0, 3], sizes = [4, 138], strides = [1, 1]} : vector<4x146xbf16> to vector<4x138xbf16>
    %30 = vector.extract_strided_slice %1 {offsets = [0, 4], sizes = [4, 138], strides = [1, 1]} : vector<4x146xbf16> to vector<4x138xbf16>
    %31 = vector.extract_strided_slice %3 {offsets = [0, 4], sizes = [4, 138], strides = [1, 1]} : vector<4x146xbf16> to vector<4x138xbf16>
    %32 = vector.extract_strided_slice %1 {offsets = [0, 5], sizes = [4, 138], strides = [1, 1]} : vector<4x146xbf16> to vector<4x138xbf16>
    %33 = vector.extract_strided_slice %3 {offsets = [0, 5], sizes = [4, 138], strides = [1, 1]} : vector<4x146xbf16> to vector<4x138xbf16>
    %34 = vector.extract_strided_slice %1 {offsets = [0, 6], sizes = [4, 138], strides = [1, 1]} : vector<4x146xbf16> to vector<4x138xbf16>
    %35 = vector.extract_strided_slice %3 {offsets = [0, 6], sizes = [4, 138], strides = [1, 1]} : vector<4x146xbf16> to vector<4x138xbf16>
    %36 = vector.extract_strided_slice %1 {offsets = [0, 7], sizes = [4, 138], strides = [1, 1]} : vector<4x146xbf16> to vector<4x138xbf16>
    %37 = vector.extract_strided_slice %3 {offsets = [0, 7], sizes = [4, 138], strides = [1, 1]} : vector<4x146xbf16> to vector<4x138xbf16>
    %38 = vector.extract_strided_slice %1 {offsets = [0, 8], sizes = [4, 138], strides = [1, 1]} : vector<4x146xbf16> to vector<4x138xbf16>
    %39 = tpu.concatenate %23, %24, %25, %26, %27, %28, %29, %30, %31, %32, %33, %34, %35, %36, %37, %38 in 0 : vector<4x138xbf16>, vector<4x138xbf16>, vector<4x138xbf16>, vector<4x138xbf16>, vector<4x138xbf16>, vector<4x138xbf16>, vector<4x138xbf16>, vector<4x138xbf16>, vector<4x138xbf16>, vector<4x138xbf16>, vector<4x138xbf16>, vector<4x138xbf16>, vector<4x138xbf16>, vector<4x138xbf16>, vector<4x138xbf16>, vector<4x138xbf16> -> vector<64x138xbf16>
    %c0_8 = arith.constant 0 : index
    %c0_9 = arith.constant 0 : index
    %40 = vector.load %arg2[%c0_8, %c0_9] : memref<24x64xbf16, #tpu.memory_space<vmem>>, vector<24x64xbf16>
    %cst_10 = arith.constant dense<0.000000e+00> : vector<24x138xf32>
    %41 = tpu.matmul %40, %39, %cst_10 {dimension_numbers = #tpu.dot_dimension_numbers<[1], [0], [0], [1], [0, 0, 1, 1], [], []>} : vector<24x64xbf16>, vector<64x138xbf16>, vector<24x138xf32> -> vector<24x138xf32>
    %42 = arith.maximumf %22, %41 : vector<24x138xf32>
    %c0_11 = arith.constant 0 : index
    %c0_12 = arith.constant 0 : index
    %43 = vector.load %arg3[%c0_11, %c0_12] : memref<24x1xf32, #tpu.memory_space<vmem>>, vector<24x1xf32>
    %44 = vector.broadcast %43 : vector<24x1xf32> to vector<24x138xf32>
    %45 = arith.addf %42, %44 : vector<24x138xf32>
    %c0_13 = arith.constant 0 : index
    %c0_14 = arith.constant 0 : index
    %46 = vector.load %arg4[%c0_13, %c0_14] : memref<1x138xf32, #tpu.memory_space<vmem>>, vector<1x138xf32>
    %47 = vector.broadcast %46 : vector<1x138xf32> to vector<24x138xf32>
    %48 = arith.mulf %45, %47 : vector<24x138xf32>
    %49 = arith.truncf %48 : vector<24x138xf32> to vector<24x138xbf16>
    %50 = vector.extract_strided_slice %49 {offsets = [0, 0], sizes = [24, 131], strides = [1, 1]} : vector<24x138xbf16> to vector<24x131xbf16>
    %51 = vector.extract_strided_slice %49 {offsets = [0, 1], sizes = [24, 131], strides = [1, 1]} : vector<24x138xbf16> to vector<24x131xbf16>
    %52 = vector.extract_strided_slice %49 {offsets = [0, 2], sizes = [24, 131], strides = [1, 1]} : vector<24x138xbf16> to vector<24x131xbf16>
    %53 = vector.extract_strided_slice %49 {offsets = [0, 3], sizes = [24, 131], strides = [1, 1]} : vector<24x138xbf16> to vector<24x131xbf16>
    %54 = vector.extract_strided_slice %49 {offsets = [0, 4], sizes = [24, 131], strides = [1, 1]} : vector<24x138xbf16> to vector<24x131xbf16>
    %55 = vector.extract_strided_slice %49 {offsets = [0, 5], sizes = [24, 131], strides = [1, 1]} : vector<24x138xbf16> to vector<24x131xbf16>
    %56 = vector.extract_strided_slice %49 {offsets = [0, 6], sizes = [24, 131], strides = [1, 1]} : vector<24x138xbf16> to vector<24x131xbf16>
    %57 = vector.extract_strided_slice %49 {offsets = [0, 7], sizes = [24, 131], strides = [1, 1]} : vector<24x138xbf16> to vector<24x131xbf16>
    %58 = tpu.concatenate %50, %51, %52, %53, %54, %55, %56, %57 in 0 : vector<24x131xbf16>, vector<24x131xbf16>, vector<24x131xbf16>, vector<24x131xbf16>, vector<24x131xbf16>, vector<24x131xbf16>, vector<24x131xbf16>, vector<24x131xbf16> -> vector<192x131xbf16>
    %c0_15 = arith.constant 0 : index
    %c0_16 = arith.constant 0 : index
    %59 = vector.load %arg5[%c0_15, %c0_16] : memref<16x192xbf16, #tpu.memory_space<vmem>>, vector<16x192xbf16>
    %cst_17 = arith.constant dense<0.000000e+00> : vector<16x131xf32>
    %60 = tpu.matmul %59, %58, %cst_17 {dimension_numbers = #tpu.dot_dimension_numbers<[1], [0], [0], [1], [0, 0, 1, 1], [], []>} : vector<16x192xbf16>, vector<192x131xbf16>, vector<16x131xf32> -> vector<16x131xf32>
    %c0_18 = arith.constant 0 : index
    %c0_19 = arith.constant 0 : index
    %61 = vector.load %arg6[%c0_18, %c0_19] : memref<16x1xf32, #tpu.memory_space<vmem>>, vector<16x1xf32>
    %62 = vector.broadcast %61 : vector<16x1xf32> to vector<16x131xf32>
    %63 = arith.addf %60, %62 : vector<16x131xf32>
    %c0_20 = arith.constant 0 : index
    %c0_21 = arith.constant 0 : index
    %64 = vector.load %arg7[%c0_20, %c0_21] : memref<1x131xf32, #tpu.memory_space<vmem>>, vector<1x131xf32>
    %65 = vector.broadcast %64 : vector<1x131xf32> to vector<16x131xf32>
    %66 = arith.mulf %63, %65 : vector<16x131xf32>
    %67 = arith.truncf %66 : vector<16x131xf32> to vector<16x131xbf16>
    %68 = vector.extract_strided_slice %67 {offsets = [0, 0], sizes = [16, 128], strides = [1, 1]} : vector<16x131xbf16> to vector<16x128xbf16>
    %69 = vector.extract_strided_slice %67 {offsets = [0, 1], sizes = [16, 128], strides = [1, 1]} : vector<16x131xbf16> to vector<16x128xbf16>
    %70 = vector.extract_strided_slice %67 {offsets = [0, 2], sizes = [16, 128], strides = [1, 1]} : vector<16x131xbf16> to vector<16x128xbf16>
    %71 = vector.extract_strided_slice %67 {offsets = [0, 3], sizes = [16, 128], strides = [1, 1]} : vector<16x131xbf16> to vector<16x128xbf16>
    %72 = tpu.concatenate %68, %69, %70, %71 in 0 : vector<16x128xbf16>, vector<16x128xbf16>, vector<16x128xbf16>, vector<16x128xbf16> -> vector<64x128xbf16>
    %c0_22 = arith.constant 0 : index
    %c0_23 = arith.constant 0 : index
    %73 = vector.load %arg8[%c0_22, %c0_23] : memref<8x64xbf16, #tpu.memory_space<vmem>>, vector<8x64xbf16>
    %cst_24 = arith.constant dense<0.000000e+00> : vector<8x128xf32>
    %74 = tpu.matmul %73, %72, %cst_24 {dimension_numbers = #tpu.dot_dimension_numbers<[1], [0], [0], [1], [0, 0, 1, 1], [], []>} : vector<8x64xbf16>, vector<64x128xbf16>, vector<8x128xf32> -> vector<8x128xf32>
    %c0_25 = arith.constant 0 : index
    %c0_26 = arith.constant 0 : index
    %75 = vector.load %arg9[%c0_25, %c0_26] : memref<8x1xf32, #tpu.memory_space<vmem>>, vector<8x1xf32>
    %76 = vector.broadcast %75 : vector<8x1xf32> to vector<8x128xf32>
    %77 = arith.addf %74, %76 : vector<8x128xf32>
    %c0_27 = arith.constant 0 : index
    %c0_28 = arith.constant 0 : index
    %c0_29 = arith.constant 0 : index
    %78 = vector.load %arg10[%c0_27, %c0_28, %c0_29] : memref<1x8x128xf32, #tpu.memory_space<vmem>>, vector<1x8x128xf32>
    %79 = vector.shape_cast %78 : vector<1x8x128xf32> to vector<8x128xf32>
    %80 = vector.shape_cast %77 : vector<8x128xf32> to vector<1x8x128xf32>
    tpu.vector_store %arg10[%c0_27, %c0_28, %c0_29], %80 {strides = array<i32>} : memref<1x8x128xf32, #tpu.memory_space<vmem>>, vector<1x8x128xf32>,
    return
  }
  func.func @transform_0(%arg0: i32) -> (i32, i32, i32, i32) {
    %c0_i32 = arith.constant 0 : i32
    %c0_i32_0 = arith.constant 0 : i32
    %c0_i32_1 = arith.constant 0 : i32
    %c0_i32_2 = arith.constant 0 : i32
    return %arg0, %c0_i32, %c0_i32_0, %c0_i32_1 : i32, i32, i32, i32
  }
  func.func @transform_1(%arg0: i32) -> (i32, i32) {
    %c0_i32 = arith.constant 0 : i32
    %c0_i32_0 = arith.constant 0 : i32
    %c0_i32_1 = arith.constant 0 : i32
    return %c0_i32, %c0_i32_0 : i32, i32
  }
  func.func @transform_2(%arg0: i32) -> (i32, i32) {
    %c0_i32 = arith.constant 0 : i32
    %c0_i32_0 = arith.constant 0 : i32
    %c0_i32_1 = arith.constant 0 : i32
    return %c0_i32, %c0_i32_0 : i32, i32
  }
  func.func @transform_3(%arg0: i32) -> (i32, i32) {
    %c0_i32 = arith.constant 0 : i32
    %c0_i32_0 = arith.constant 0 : i32
    %c0_i32_1 = arith.constant 0 : i32
    return %c0_i32, %c0_i32_0 : i32, i32
  }
  func.func @transform_4(%arg0: i32) -> (i32, i32) {
    %c0_i32 = arith.constant 0 : i32
    %c0_i32_0 = arith.constant 0 : i32
    %c0_i32_1 = arith.constant 0 : i32
    return %c0_i32, %c0_i32_0 : i32, i32
  }
  func.func @transform_5(%arg0: i32) -> (i32, i32) {
    %c0_i32 = arith.constant 0 : i32
    %c0_i32_0 = arith.constant 0 : i32
    %c0_i32_1 = arith.constant 0 : i32
    return %c0_i32, %c0_i32_0 : i32, i32
  }
  func.func @transform_6(%arg0: i32) -> (i32, i32) {
    %c0_i32 = arith.constant 0 : i32
    %c0_i32_0 = arith.constant 0 : i32
    %c0_i32_1 = arith.constant 0 : i32
    return %c0_i32, %c0_i32_0 : i32, i32
  }
  func.func @transform_7(%arg0: i32) -> (i32, i32) {
    %c0_i32 = arith.constant 0 : i32
    %c0_i32_0 = arith.constant 0 : i32
    %c0_i32_1 = arith.constant 0 : i32
    return %c0_i32, %c0_i32_0 : i32, i32
  }
  func.func @transform_8(%arg0: i32) -> (i32, i32) {
    %c0_i32 = arith.constant 0 : i32
    %c0_i32_0 = arith.constant 0 : i32
    %c0_i32_1 = arith.constant 0 : i32
    return %c0_i32, %c0_i32_0 : i32, i32
  }
  func.func @transform_9(%arg0: i32) -> (i32, i32, i32) {
    %c0_i32 = arith.constant 0 : i32
    %c0_i32_0 = arith.constant 0 : i32
    %c0_i32_1 = arith.constant 0 : i32
    return %arg0, %c0_i32, %c0_i32_0 : i32, i32, i32
  }
}

</mosaic_0001>

<bundles_post_ra>
// kernel: conv_layer_forward.1
= control target key start
LH: loop header
LB: loop body
LE: loop exit
PB: predicated region body
PF: predicated region fallthrough
CT: control target
= control target key end

     0   :  { %s1307_s30 = smov 0   ;;  %s1622_s0 = inlined_call_operand.vmem [shape: bf16[2,2,4,146], index: 0, kind: input, shape index: {}]   ;;  %s1623_s1 = inlined_call_operand.vmem [shape: bf16[24,64], index: 1, kind: input, shape index: {}]   ;;  %s1624_s2 = inlined_call_operand.vmem [shape: f32[24,1], index: 2, kind: input, shape index: {}]   ;;  %s1625_s3 = inlined_call_operand.vmem [shape: f32[1,138], index: 3, kind: input, shape index: {}]   ;;  %s1626_s4 = inlined_call_operand.vmem [shape: bf16[16,192], index: 4, kind: input, shape index: {}]   ;;  %s1627_s5 = inlined_call_operand.vmem [shape: f32[16,1], index: 5, kind: input, shape index: {}]   ;;  %s1628_s6 = inlined_call_operand.vmem [shape: f32[1,131], index: 6, kind: input, shape index: {}]   ;;  %s1629_s7 = inlined_call_operand.vmem [shape: bf16[8,64], index: 7, kind: input, shape index: {}]   ;;  %s1630_s8 = inlined_call_operand.vmem [shape: f32[8,1], index: 8, kind: input, shape index: {}]   ;;  %s1631_s9 = inlined_call_operand.vmem [shape: f32[2,8,128], index: 9, kind: output, shape index: {}]  }
   0x1 LB: > { %s1169_s10 = sadd.s32 4294967295, %s1243_s30   ;;  %p1173_p0 = scmp.ge.s32.totalorder %s1243_s30, 1  ;;  %s1243_s30 = sphi %s1307_s30, %s19_s30  }
   0x2   : > { %p287_p1 = scmp.lt.s32.totalorder %s1243_s30, 3 }
   0x4   : > { %p288_p2 = pnand %p1173_p0, %p287_p1 }
   0x5   : > { %p322_p3 = scmp.lt.s32.totalorder (!%p288_p2), %s1169_s10, 1  ;;  %v339_v0 = vlaneseq (!%p288_p2)  ;;  %v1245_v1 = vmov (!%p288_p2), 1983009808   ;;  %s1246_s15 = smov (!%p288_p2), 127   ;;  %vm440_vm0 = vcmask (!%p288_p2), 1041408   ;;  %v1253_v21 = vmov (!%p288_p2), 0  }
   0x6   : > { %291 = sbr.rel (%p288_p2) target bundleno = 1211 (0x4bb), region = 56  ;;  %v337_v2 = vunpack.c.l.s4 (!%p288_p2), %v1245_v1  ;;  %s1247_s16 = smov (!%p288_p2), 126   ;;  %557 = vmatprep.mubr.bf16.mxu1 (!%p288_p2), %v1253_v21  ;;  %1229 = vset.pattern.permute.xlu1 (!%p288_p2), %v1253_v21  ;;  %vm447_vm1 = vcmask (!%p288_p2), 1043456   ;;  %vm452_vm2 = vcmask (!%p288_p2), 1045504   ;;  %v785_v26 = vld [vmem:[%s1624_s2] sm:$0xff] (!%p288_p2)  ;;  %v786_v28 = vld [vmem:[%s1624_s2 + $0x8] sm:$0xff] (!%p288_p2) }
   0x7   : > { %v1317_v3 = vshrl.u32 (!%p288_p2), %v339_v0, 7  ;;  %s1248_s17 = smov (!%p288_p2), 125   ;;  %s1249_s18 = smov (!%p288_p2), 124   ;;  %1228 = vset.pattern.permute.xlu0 (!%p288_p2), %v1253_v21  ;;  %v787_v32 = vld [vmem:[%s1624_s2 + $0x10] sm:$0xff] (!%p288_p2)  ;;  %vm366_vm3 = vcmask (!%p288_p2), 1039360   ;;  %vm389_vm4 = vcmask (!%p288_p2), 1022976  }
   0x8   : > { %v338_v4 = vunpack.c.0.s8 (!%p288_p2), %v337_v2  ;;  %s1250_s19 = smov (!%p288_p2), 123   ;;  %s1251_s20 = smov (!%p288_p2), 122   ;;  %vm378_vm5 = vcmask (!%p288_p2), 1031168   ;;  %vm411_vm6 = vcmask (!%p288_p2), 1006592   ;;  %vm400_vm7 = vcmask (!%p288_p2), 1014784  }
   0x9   : > { %s1252_s21 = smov (!%p288_p2), 121   ;;  %s1254_s22 = smov (!%p288_p2), 120   ;;  %vm433_vm8 = vcmask (!%p288_p2), 990208   ;;  %vm422_vm9 = vcmask (!%p288_p2), 998400   ;;  %vm518_vm10 = vcmask (!%p288_p2), 523264   ;;  %vm662_vm11 = vcmask (!%p288_p2), 982016  }
   0xa   : > { %v341_v5 = vsub.s32 (!%p288_p2), %v338_v4, %v1317_v3  ;;  %vm1256_vm12 = vmmov (!%p288_p2), 0  }
   0xd   : > { %s1633_s10 = smov (!%p322_p3, %s1169_s10), 1 }
   0xe   : > { %s1190_s11 = sshll.u32 %s1633_s10, 3 }
   0xf   : > { %s326_s14 = scalar_lea.vmem %s1622_s0, %s1190_s11 }
  0x10   : > { %v332_v6 = vld [vmem:[%s326_s14] sm:$0xf]  ;;  %v1177_v7 = vld [vmem:[%s326_s14 + $0x4] sm:$0xf] }
  0x11   : > { %v342_v8 = vrot.slane %v332_v6, %v341_v5  ;;  %v345_v9 = vcombine.low %v1177_v7, %v1177_v7  ;;  %v577_v17 = vcombine.low %v332_v6, %v332_v6  ;;  %v1358_v19 = vrot.slane %v1177_v7, %v341_v5 }
  0x13   : > { %364 = vrot.lane.b32.xlu0 %v342_v8, %s1246_s15  ;;  %v352_v10 = vrot.slane %v345_v9, %v341_v5  ;;  %v343_v11 = vcombine.high %v342_v8, %v342_v8  ;;  %v361_v14 = vcombine.low %v342_v8, %v342_v8  ;;  %v584_v18 = vrot.slane %v577_v17, %v341_v5 }
  0x14   : > { %v591_v22 = vcombine.low %v1358_v19, %v1358_v19  ;;  %v1376_v24 = vcombine.high %v1358_v19, %v1358_v19 }
  0x15   : > { %371 = vrot.lane.b32.xlu1 %v352_v10, %s1246_s15  ;;  %v360_v12 = vcombine.high %v352_v10, %v352_v10  ;;  %v1329_v13 = vsel %vm440_vm0, %v342_v8, %v352_v10  ;;  %v368_v16 = vcombine.low %v352_v10, %v352_v10  ;;  %v585_v20 = vcombine.high %v584_v18, %v584_v18 }
  0x16   : > { %v597_v23 = vcombine.low %v584_v18, %v584_v18 }
  0x17   : > { %374 = vrot.lane.b32.xlu0 %v342_v8, %s1247_s16  ;;  %v1333_v15 = vsel %vm440_vm0, %v343_v11, %v360_v12 }
  0x19   : > { %376 = vrot.lane.b32.xlu1 %v343_v11, %s1247_s16 }
  0x1b   : > { %362 = vrot.lane.b32.xlu0 %v361_v14, %s1246_s15 }
  0x1d   : > { %369 = vrot.lane.b32.xlu1 %v368_v16, %s1246_s15 }
  0x1f   : > { %380 = vrot.lane.b32.xlu0 %v352_v10, %s1247_s16 }
  0x21   : > { %382 = vrot.lane.b32.xlu1 %v360_v12, %s1247_s16 }
  0x23   : > { %385 = vrot.lane.b32.xlu0 %v361_v14, %s1248_s17 }
  0x25   : > { %387 = vrot.lane.b32.xlu1 %v342_v8, %s1248_s17 }
  0x27   : > { %391 = vrot.lane.b32.xlu0 %v368_v16, %s1248_s17 }
  0x29   : > { %393 = vrot.lane.b32.xlu1 %v352_v10, %s1248_s17 }
  0x2b   : > { %396 = vrot.lane.b32.xlu0 %v342_v8, %s1249_s18 }
  0x2d   : > { %398 = vrot.lane.b32.xlu1 %v343_v11, %s1249_s18 }
  0x2f   : > { %402 = vrot.lane.b32.xlu0 %v352_v10, %s1249_s18 }
  0x31   : > { %404 = vrot.lane.b32.xlu1 %v360_v12, %s1249_s18 }
  0x33   : > { %407 = vrot.lane.b32.xlu0 %v361_v14, %s1250_s19 }
  0x35   : > { %409 = vrot.lane.b32.xlu1 %v342_v8, %s1250_s19 }
  0x37   : > { %413 = vrot.lane.b32.xlu0 %v368_v16, %s1250_s19 }
  0x39   : > { %415 = vrot.lane.b32.xlu1 %v352_v10, %s1250_s19 }
  0x3b   : > { %418 = vrot.lane.b32.xlu0 %v342_v8, %s1251_s20 }
  0x3d   : > { %420 = vrot.lane.b32.xlu1 %v343_v11, %s1251_s20 }
  0x3f   : > { %424 = vrot.lane.b32.xlu0 %v352_v10, %s1251_s20 }
  0x41   : > { %426 = vrot.lane.b32.xlu1 %v360_v12, %s1251_s20 }
  0x43   : > { %429 = vrot.lane.b32.xlu0 %v361_v14, %s1252_s21 }
  0x45   : > { %431 = vrot.lane.b32.xlu1 %v342_v8, %s1252_s21 }
  0x47   : > { %435 = vrot.lane.b32.xlu0 %v368_v16, %s1252_s21 }
  0x49   : > { %437 = vrot.lane.b32.xlu1 %v352_v10, %s1252_s21 }
  0x4b   : > { %586 = vrot.lane.b32.xlu0 %v584_v18, %s1246_s15 }
  0x4d   : > { %588 = vrot.lane.b32.xlu1 %v585_v20, %s1246_s15 }
  0x4f   : > { %592 = vrot.lane.b32.xlu0 %v591_v22, %s1246_s15 }
  0x51   : > { %594 = vrot.lane.b32.xlu1 %v1358_v19, %s1246_s15 }
  0x53   : > { %598 = vrot.lane.b32.xlu0 %v597_v23, %s1247_s16 }
  0x55   : > { %600 = vrot.lane.b32.xlu1 %v584_v18, %s1247_s16 }
  0x57   : > { %603 = vrot.lane.b32.xlu0 %v1358_v19, %s1247_s16 }
  0x59   : > { %605 = vrot.lane.b32.xlu1 %v1376_v24, %s1247_s16 }
  0x5b   : > { %608 = vrot.lane.b32.xlu0 %v584_v18, %s1248_s17 }
  0x5d   : > { %610 = vrot.lane.b32.xlu1 %v585_v20, %s1248_s17 }
  0x5f   : > { %613 = vrot.lane.b32.xlu0 %v591_v22, %s1248_s17 }
  0x61   : > { %615 = vrot.lane.b32.xlu1 %v1358_v19, %s1248_s17 }
  0x63   : > { %618 = vrot.lane.b32.xlu0 %v597_v23, %s1249_s18 }
  0x65   : > { %620 = vrot.lane.b32.xlu1 %v584_v18, %s1249_s18 }
  0x67   : > { %623 = vrot.lane.b32.xlu0 %v1358_v19, %s1249_s18 }
  0x69   : > { %625 = vrot.lane.b32.xlu1 %v1376_v24, %s1249_s18 }
  0x6b   : > { %628 = vrot.lane.b32.xlu0 %v584_v18, %s1250_s19 }
  0x6d   : > { %630 = vrot.lane.b32.xlu1 %v585_v20, %s1250_s19 }
  0x6f   : > { %633 = vrot.lane.b32.xlu0 %v591_v22, %s1250_s19 }
  0x71   : > { %635 = vrot.lane.b32.xlu1 %v1358_v19, %s1250_s19 }
  0x73   : > { %638 = vrot.lane.b32.xlu0 %v597_v23, %s1251_s20 }
  0x75   : > { %640 = vrot.lane.b32.xlu1 %v584_v18, %s1251_s20 }
  0x77   : > { %643 = vrot.lane.b32.xlu0 %v1358_v19, %s1251_s20 }
  0x79   : > { %645 = vrot.lane.b32.xlu1 %v1376_v24, %s1251_s20 }
  0x7b   : > { %648 = vrot.lane.b32.xlu0 %v584_v18, %s1252_s21 }
  0x7d   : > { %650 = vrot.lane.b32.xlu1 %v585_v20, %s1252_s21 }
  0x7f   : > { %653 = vrot.lane.b32.xlu0 %v591_v22, %s1252_s21 }
  0x81   : > { %655 = vrot.lane.b32.xlu1 %v1358_v19, %s1252_s21 }
  0x83   : > { %658 = vrot.lane.b32.xlu0 %v597_v23, %s1254_s22 }
  0x85   : > { %v365_v25 = vpop.permute.xlu0 %364  ;;  %660 = vrot.lane.b32.xlu1 %v584_v18, %s1254_s22  ;;  %s330_s22 = scalar_lea.vmem %s1631_s9, %s1190_s11 }
  0x86   : > { %v451_v27 = vsel %vm447_vm1, %v1333_v15, %v365_v25 }
  0x87   : > { %v372_v29 = vpop.permute.xlu1 %371  ;;  %790 = vperm.xlu0 %1228, %v785_v26  }
  0x88   : > { %v457_v30 = vsel %vm452_vm2, %v451_v27, %v372_v29 }
  0x89   : > { %v375_v31 = vpop.permute.xlu0 %374  ;;  %525 = vmatprep.subr.bf16.mxu1 %v457_v30  ;;  %795 = vperm.xlu1 %1229, %v786_v28  }
  0x8b   : > { %v377_v33 = vpop.permute.xlu1 %376 }
  0x8c   : > { %v379_v47 = vsel %vm378_vm5, %v375_v31, %v377_v33 }
  0x8d   : > { %v363_v34 = vpop.permute.xlu0 %362  ;;  %800 = vperm.xlu1 %1229, %v787_v32  }
  0x8e   : > { %v367_v35 = vsel %vm366_vm3, %v363_v34, %v365_v25 }
  0x8f   : > { %v370_v36 = vpop.permute.xlu1 %369  ;;  %v449_v37 = vsel %vm447_vm1, %v1329_v13, %v367_v35 }
  0x90   : > { %v373_v38 = vsel %vm366_vm3, %v370_v36, %v372_v29 }
  0x91   : > { %v454_v39 = vsel %vm452_vm2, %v449_v37, %v373_v38  ;;  %v381_v40 = vpop.permute.xlu0 %380 }
  0x92   : > { %526 = vmatpush1.bf16.msra.mxu1 %v454_v39 }
  0x93   : > { %v383_v41 = vpop.permute.xlu1 %382 }
  0x94   : > { %v384_v44 = vsel %vm378_vm5, %v381_v40, %v383_v41  ;;  %v464_v48 = vsel %vm440_vm0, %v377_v33, %v383_v41  ;;  %v1459_v33 = vld [vmem:[%s1623_s1] sm:$0xff]   ;;  %v1469_v40 = vld [vmem:[%s1623_s1 + $0x8] ss:$0 sps:$4 sm:$0xff]  }
  0x95   : > { %v386_v42 = vpop.permute.xlu0 %385  ;;  %v461_v49 = vsel %vm440_vm0, %v379_v47, %v384_v44 }
  0x97   : > { %v388_v43 = vpop.permute.xlu1 %387 }
  0x98   : > { %v390_v45 = vsel %vm389_vm4, %v386_v42, %v388_v43  ;;  %v468_v50 = vsel %vm447_vm1, %v464_v48, %v388_v43 }
  0x99   : > { %v392_v46 = vpop.permute.xlu0 %391  ;;  %v466_v54 = vsel %vm447_vm1, %v461_v49, %v390_v45 }
  0x9b   : > { %v394_v51 = vpop.permute.xlu1 %393 }
  0x9c   : > { %v395_v52 = vsel %vm389_vm4, %v392_v46, %v394_v51  ;;  %v473_v53 = vsel %vm452_vm2, %v468_v50, %v394_v51 }
  0x9d   : > { %527 = vmatprep.subr.bf16.mxu1 %v473_v53  ;;  %v470_v55 = vsel %vm452_vm2, %v466_v54, %v395_v52  ;;  %v397_v56 = vpop.permute.xlu0 %396 }
  0x9e   : > { %528 = vmatpush1.bf16.msra.mxu1 %v470_v55 }
  0x9f   : > { %v399_v57 = vpop.permute.xlu1 %398 }
  0xa0   : > { %v401_v1 = vsel %vm400_vm7, %v397_v56, %v399_v57 }
  0xa1   : > { %v403_v58 = vpop.permute.xlu0 %402 }
  0xa3   : > { %v405_v59 = vpop.permute.xlu1 %404 }
  0xa4   : > { %v406_v62 = vsel %vm400_vm7, %v403_v58, %v405_v59  ;;  %v480_v2 = vsel %vm440_vm0, %v399_v57, %v405_v59 }
  0xa5   : > { %v408_v60 = vpop.permute.xlu0 %407  ;;  %v477_v4 = vsel %vm440_vm0, %v401_v1, %v406_v62 }
  0xa7   : > { %v410_v61 = vpop.permute.xlu1 %409 }
  0xa8   : > { %v412_v63 = vsel %vm411_vm6, %v408_v60, %v410_v61  ;;  %v484_v5 = vsel %vm447_vm1, %v480_v2, %v410_v61 }
  0xa9   : > { %v414_v0 = vpop.permute.xlu0 %413  ;;  %v482_v9 = vsel %vm447_vm1, %v477_v4, %v412_v63 }
  0xab   : > { %v416_v6 = vpop.permute.xlu1 %415 }
  0xac   : > { %v417_v7 = vsel %vm411_vm6, %v414_v0, %v416_v6  ;;  %v489_v8 = vsel %vm452_vm2, %v484_v5, %v416_v6 }
  0xad   : > { %529 = vmatprep.subr.bf16.mxu1 %v489_v8  ;;  %v486_v10 = vsel %vm452_vm2, %v482_v9, %v417_v7  ;;  %v419_v11 = vpop.permute.xlu0 %418 }
  0xae   : > { %530 = vmatpush1.bf16.msra.mxu1 %v486_v10 }
  0xaf   : > { %v421_v12 = vpop.permute.xlu1 %420 }
  0xb0   : > { %v423_v22 = vsel %vm422_vm9, %v419_v11, %v421_v12 }
  0xb1   : > { %v425_v13 = vpop.permute.xlu0 %424 }
  0xb3   : > { %v427_v14 = vpop.permute.xlu1 %426 }
  0xb4   : > { %v428_v17 = vsel %vm422_vm9, %v425_v13, %v427_v14  ;;  %v496_v23 = vsel %vm440_vm0, %v421_v12, %v427_v14 }
  0xb5   : > { %v430_v15 = vpop.permute.xlu0 %429  ;;  %v493_v25 = vsel %vm440_vm0, %v423_v22, %v428_v17 }
  0xb7   : > { %v432_v16 = vpop.permute.xlu1 %431 }
  0xb8   : > { %v434_v18 = vsel %vm433_vm8, %v430_v15, %v432_v16  ;;  %v500_v26 = vsel %vm447_vm1, %v496_v23, %v432_v16 }
  0xb9   : > { %v436_v20 = vpop.permute.xlu0 %435  ;;  %v498_v30 = vsel %vm447_vm1, %v493_v25, %v434_v18 }
  0xbb   : > { %v438_v27 = vpop.permute.xlu1 %437 }
  0xbc   : > { %v439_v28 = vsel %vm433_vm8, %v436_v20, %v438_v27  ;;  %v505_v29 = vsel %vm452_vm2, %v500_v26, %v438_v27 }
  0xbd   : > { %531 = vmatprep.subr.bf16.mxu1 %v505_v29  ;;  %v502_v31 = vsel %vm452_vm2, %v498_v30, %v439_v28  ;;  %v587_v32 = vpop.permute.xlu0 %586 }
  0xbe   : > { %532 = vmatpush1.bf16.msra.mxu1 %v502_v31 }
  0xbf   : > { %v589_v34 = vpop.permute.xlu1 %588 }
  0xc0   : > { %v590_v37 = vsel %vm366_vm3, %v587_v32, %v589_v34  ;;  %v669_v41 = vsel %vm440_vm0, %v1376_v24, %v589_v34 }
  0xc1   : > { %v593_v35 = vpop.permute.xlu0 %592  ;;  %1180 = vmatmul.mubr.msk.bf16.vlgmr.msra.gmra.mrb[0].mxu1 %vm518_vm10, %v1459_v33  ;;  %v666_v42 = vsel %vm440_vm0, %v1358_v19, %v590_v37 }
  0xc2   : > { %567 = vmatprep.mubr.bf16.mxu1 %v1253_v21 }
  0xc3   : > { %v595_v36 = vpop.permute.xlu1 %594 }
  0xc4   : > { %v596_v38 = vsel %vm366_vm3, %v593_v35, %v595_v36  ;;  %v673_v43 = vsel %vm447_vm1, %v669_v41, %v595_v36 }
  0xc5   : > { %v599_v39 = vpop.permute.xlu0 %598  ;;  %v671_v45 = vsel %vm447_vm1, %v666_v42, %v596_v38 }
  0xc7   : > { %v601_v44 = vpop.permute.xlu1 %600 }
  0xc8   : > { %v602_v46 = vsel %vm378_vm5, %v599_v39, %v601_v44  ;;  %v678_v47 = vsel %vm452_vm2, %v673_v43, %v601_v44 }
  0xc9   : > { %728 = vmatprep.subr.bf16.mxu1 %v678_v47  ;;  %v675_v48 = vsel %vm452_vm2, %v671_v45, %v602_v46  ;;  %v604_v49 = vpop.permute.xlu0 %603  ;;  %1181 = vmatmul.mubr.msk.bf16.gmra.mrb[4].mxu1 %vm518_vm10, %v1469_v40 }
  0xca   : > { %729 = vmatpush1.bf16.msra.mxu1 %v675_v48  ;;  %760 = vmatprep.mubr.bf16.mxu1 %v1253_v21 }
  0xcb   : > { %v606_v19 = vpop.permute.xlu1 %605 }
  0xcc   : > { %v607_v56 = vsel %vm378_vm5, %v604_v49, %v606_v19 }
  0xcd   : > { %v609_v24 = vpop.permute.xlu0 %608 }
  0xcf   : > { %v611_v50 = vpop.permute.xlu1 %610 }
  0xd0   : > { %v612_v53 = vsel %vm389_vm4, %v609_v24, %v611_v50  ;;  %v685_v57 = vsel %vm440_vm0, %v606_v19, %v611_v50  ;;  %v813_v24 = vsub.s32 0, %v1317_v3 }
  0xd1   : > { %v614_v51 = vpop.permute.xlu0 %613  ;;  %v682_v58 = vsel %vm440_vm0, %v607_v56, %v612_v53 }
  0xd3   : > { %v616_v52 = vpop.permute.xlu1 %615 }
  0xd4   : > { %v617_v54 = vsel %vm389_vm4, %v614_v51, %v616_v52  ;;  %v689_v59 = vsel %vm447_vm1, %v685_v57, %v616_v52 }
  0xd5   : > { %v619_v55 = vpop.permute.xlu0 %618  ;;  %v687_v61 = vsel %vm447_vm1, %v682_v58, %v617_v54 }
  0xd7   : > { %v621_v60 = vpop.permute.xlu1 %620 }
  0xd8   : > { %v622_v62 = vsel %vm400_vm7, %v619_v55, %v621_v60  ;;  %v694_v63 = vsel %vm452_vm2, %v689_v59, %v621_v60 }
  0xd9   : > { %730 = vmatprep.subr.bf16.mxu1 %v694_v63  ;;  %v691_v0 = vsel %vm452_vm2, %v687_v61, %v622_v62  ;;  %v624_v1 = vpop.permute.xlu0 %623 }
  0xda   : > { %731 = vmatpush1.bf16.msra.mxu1 %v691_v0 }
  0xdb   : > { %v626_v2 = vpop.permute.xlu1 %625 }
  0xdc   : > { %v627_v11 = vsel %vm400_vm7, %v624_v1, %v626_v2 }
  0xdd   : > { %v629_v4 = vpop.permute.xlu0 %628 }
  0xdf   : > { %v631_v5 = vpop.permute.xlu1 %630 }
  0xe0   : > { %v632_v8 = vsel %vm411_vm6, %v629_v4, %v631_v5  ;;  %v701_v12 = vsel %vm440_vm0, %v626_v2, %v631_v5 }
  0xe1   : > { %v634_v6 = vpop.permute.xlu0 %633  ;;  %v698_v13 = vsel %vm440_vm0, %v627_v11, %v632_v8 }
  0xe3   : > { %v636_v7 = vpop.permute.xlu1 %635 }
  0xe4   : > { %v637_v9 = vsel %vm411_vm6, %v634_v6, %v636_v7  ;;  %v705_v14 = vsel %vm447_vm1, %v701_v12, %v636_v7 }
  0xe5   : > { %v639_v10 = vpop.permute.xlu0 %638  ;;  %v703_v16 = vsel %vm447_vm1, %v698_v13, %v637_v9 }
  0xe7   : > { %v641_v15 = vpop.permute.xlu1 %640 }
  0xe8   : > { %v642_v17 = vsel %vm422_vm9, %v639_v10, %v641_v15  ;;  %v710_v18 = vsel %vm452_vm2, %v705_v14, %v641_v15 }
  0xe9   : > { %732 = vmatprep.subr.bf16.mxu1 %v710_v18  ;;  %v707_v20 = vsel %vm452_vm2, %v703_v16, %v642_v17  ;;  %v644_v22 = vpop.permute.xlu0 %643 }
  0xea   : > { %733 = vmatpush1.bf16.msra.mxu1 %v707_v20 }
  0xeb   : > { %v646_v23 = vpop.permute.xlu1 %645 }
  0xec   : > { %v647_v32 = vsel %vm422_vm9, %v644_v22, %v646_v23 }
  0xed   : > { %v649_v25 = vpop.permute.xlu0 %648 }
  0xef   : > { %v651_v26 = vpop.permute.xlu1 %650 }
  0xf0   : > { %v652_v29 = vsel %vm433_vm8, %v649_v25, %v651_v26  ;;  %v717_v34 = vsel %vm440_vm0, %v646_v23, %v651_v26 }
  0xf1   : > { %v654_v27 = vpop.permute.xlu0 %653  ;;  %v714_v35 = vsel %vm440_vm0, %v647_v32, %v652_v29  ;;  %v961_v32 = vld [vmem:[%s1627_s5 + $0x8] sm:$0xff] }
  0xf3   : > { %v656_v28 = vpop.permute.xlu1 %655 }
  0xf4   : > { %v657_v30 = vsel %vm433_vm8, %v654_v27, %v656_v28  ;;  %v721_v36 = vsel %vm447_vm1, %v717_v34, %v656_v28 }
  0xf5   : > { %v659_v31 = vpop.permute.xlu0 %658  ;;  %v719_v38 = vsel %vm447_vm1, %v714_v35, %v657_v30  ;;  %v1236_v30 = vld [vmem:[%s1626_s4 + $0x4] ss:$8 sps:$4 sm:$0xff]  }
  0xf6   : > { %1186 = vmatprep.mubr.msk.bf16.mxu0 %vm518_vm10, %v1236_v30 }
  0xf7   : > { %v661_v37 = vpop.permute.xlu1 %660 }
  0xf8   : > { %v663_v39 = vsel %vm662_vm11, %v659_v31, %v661_v37  ;;  %v726_v41 = vsel %vm452_vm2, %v721_v36, %v661_v37  ;;  %v960_v31 = vld [vmem:[%s1627_s5] sm:$0xff] }
  0xf9   : > { %734 = vmatprep.subr.bf16.mxu1 %v726_v41  ;;  %v723_v42 = vsel %vm452_vm2, %v719_v38, %v663_v39 }
  0xfa   : > { %735 = vmatpush1.bf16.msra.mxu1 %v723_v42 }
  0xfd   : > { %1182 = vmatmul.mubr.msk.bf16.vlgmr.msra.gmra.mrb[8].mxu1 %vm518_vm10, %v1459_v33  ;;  %v809_v33 = vld [vmem:[%s1625_s3] sm:$0x3] }
  0xfe   : > { %770 = vmatprep.mubr.bf16.mxu1 %v1253_v21  ;;  %v817_v21 = vsub.s32 1, %v1317_v3  ;;  %v814_v55 = vrot.slane %v809_v33, %v813_v24  ;;  %v1066_v3 = vld [vmem:[%s1630_s8] sm:$0xff] }
 0x100   : > { %v818_v60 = vrot.slane %v809_v33, %v817_v21 }
 0x105   : > { %1183 = vmatmul.mubr.msk.bf16.gmra.mrb[12].mxu1 %vm518_vm10, %v1469_v40 }
 0x106   : > { %v791_v51 = vpop.permute.xlu0 %790 }
 0x108   : > { %v796_v59 = vpop.permute.xlu1 %795 }
 0x10c   : > { %v801_v11 = vpop.permute.xlu1 %800 }
 0x194   : > { %v559_v43 = vpop.f32.mrb[0].mxu1 }
 0x195   : > { %v561_v44 = vpop.f32.mrb[1].mxu1 }
 0x196   : > { %v563_v45 = vpop.f32.mrb[2].mxu1 }
 0x197   : > { %v565_v46 = vpop.f32.mrb[3].mxu1 }
 0x19c   : > { %v569_v47 = vpop.f32.mrb[4].mxu1 }
 0x19d   : > { %v571_v48 = vpop.f32.mrb[5].mxu1 }
 0x19e   : > { %v573_v49 = vpop.f32.mrb[6].mxu1 }
 0x19f   : > { %v574_v19 = vpop.f32.mrb[7].mxu1 }
 0x1d0   : > { %v762_v50 = vpop.f32.mrb[8].mxu1 }
 0x1d1   : > { %v779_v52 = vmax.f32 %v559_v43, %v762_v50  ;;  %v764_v40 = vpop.f32.mrb[9].mxu1 }
 0x1d2   : > { %v780_v53 = vmax.f32 %v561_v44, %v764_v40  ;;  %v766_v54 = vpop.f32.mrb[10].mxu1 }
 0x1d3   : > { %v803_v56 = vadd.f32 %v791_v51, %v779_v52  ;;  %v781_v57 = vmax.f32 %v563_v45, %v766_v54  ;;  %v768_v58 = vpop.f32.mrb[11].mxu1 }
 0x1d4   : > { %v804_v61 = vadd.f32 %v791_v51, %v780_v53  ;;  %v782_v62 = vmax.f32 %v565_v46, %v768_v58 }
 0x1d5   : > { %v805_v63 = vadd.f32 %v796_v59, %v781_v57  ;;  %v821_v1 = vmul.f32 %v814_v55, %v803_v56 }
 0x1d6   : > { %v806_v0 = vadd.f32 %v796_v59, %v782_v62  ;;  %v822_v4 = vmul.f32 %v818_v60, %v804_v61 }
 0x1d7   : > { %v823_v2 = vmul.f32 %v814_v55, %v805_v63 }
 0x1d8   : > { %v824_v5 = vmul.f32 %v818_v60, %v806_v0  ;;  %v772_v6 = vpop.f32.mrb[12].mxu1 }
 0x1d9   : > { %v827_v7 = vpack.c.bf16 %v823_v2, %v821_v1  ;;  %v783_v8 = vmax.f32 %v569_v47, %v772_v6  ;;  %v774_v9 = vpop.f32.mrb[13].mxu1 }
 0x1da   : > { %v828_v10 = vpack.c.bf16 %v824_v5, %v822_v4  ;;  %v784_v12 = vmax.f32 %v571_v48, %v774_v9  ;;  %v776_v13 = vpop.f32.mrb[14].mxu1 }
 0x1db   : > { %v807_v14 = vadd.f32 %v801_v11, %v783_v8  ;;  %854 = vrot.lane.b32.xlu0 %v827_v7, %s1247_s16  ;;  %v777_v15 = vpop.f32.mrb[15].mxu1  ;;  %v836_v17 = vrot.slane %v827_v7, 4 }
 0x1dc   : > { %v808_v16 = vadd.f32 %v801_v11, %v784_v12  ;;  %856 = vrot.lane.b32.xlu1 %v828_v10, %s1247_s16  ;;  %984 = vmatprep.subr.bf16.mxu0 %v828_v10  ;;  %v837_v20 = vrot.slane %v828_v10, 4 }
 0x1dd   : > { %985 = vmatpush1.bf16.msra.mxu0 %v827_v7  ;;  %v825_v18 = vmul.f32 %v814_v55, %v807_v14 }
 0x1de   : > { %v826_v22 = vmul.f32 %v818_v60, %v808_v16 }
 0x1df   : > { %842 = vrot.lane.b32.xlu0 %v836_v17, %s1246_s15  ;;  %v829_v23 = vpack.c.bf16 %v825_v18, %v825_v18 }
 0x1e0   : > { %844 = vrot.lane.b32.xlu1 %v837_v20, %s1246_s15  ;;  %v830_v25 = vpack.c.bf16 %v826_v22, %v826_v22  ;;  %v1255_v22 = vmov 0.0  }
 0x1e1   : > { %v838_v26 = vrot.slane %v829_v23, 4  ;;  %1196 = vmatprep.subr.bf16.mxu1 %v1255_v22  ;;  %1204 = vmatprep.mubr.msk.bf16.mxu1 %vm1256_vm12, %v1255_v22 }
 0x1e2   : > { %v840_v27 = vrot.slane %v830_v25, 4 }
 0x1e3   : > { %866 = vrot.lane.b32.xlu0 %v836_v17, %s1248_s17  ;;  %v839_v28 = vsel %vm447_vm1, %v836_v17, %v838_v26 }
 0x1e4   : > { %868 = vrot.lane.b32.xlu1 %v837_v20, %s1248_s17  ;;  %v841_v29 = vsel %vm447_vm1, %v837_v20, %v840_v27 }
 0x1e7   : > { %858 = vrot.lane.b32.xlu0 %v829_v23, %s1247_s16 }
 0x1e8   : > { %860 = vrot.lane.b32.xlu1 %v830_v25, %s1247_s16 }
 0x1eb   : > { %846 = vrot.lane.b32.xlu0 %v839_v28, %s1246_s15 }
 0x1ec   : > { %848 = vrot.lane.b32.xlu1 %v841_v29, %s1246_s15 }
 0x1ef   : > { %878 = vrot.lane.b32.xlu0 %v827_v7, %s1249_s18 }
 0x1f0   : > { %880 = vrot.lane.b32.xlu1 %v828_v10, %s1249_s18 }
 0x1f3   : > { %870 = vrot.lane.b32.xlu0 %v839_v28, %s1248_s17 }
 0x1f4   : > { %884 = vrot.lane.b32.xlu1 %v830_v25, %s1249_s18 }
 0x1f7   : > { %882 = vrot.lane.b32.xlu0 %v829_v23, %s1249_s18 }
 0x1f8   : > { %872 = vrot.lane.b32.xlu1 %v841_v29, %s1248_s17 }
 0x1fb   : > { %890 = vrot.lane.b32.xlu0 %v836_v17, %s1250_s19 }
 0x1fc   : > { %892 = vrot.lane.b32.xlu1 %v837_v20, %s1250_s19 }
 0x1ff   : > { %894 = vrot.lane.b32.xlu0 %v839_v28, %s1250_s19 }
 0x200   : > { %904 = vrot.lane.b32.xlu1 %v828_v10, %s1251_s20 }
 0x203   : > { %902 = vrot.lane.b32.xlu0 %v827_v7, %s1251_s20 }
 0x204   : > { %896 = vrot.lane.b32.xlu1 %v841_v29, %s1250_s19 }
 0x207   : > { %906 = vrot.lane.b32.xlu0 %v829_v23, %s1251_s20 }
 0x208   : > { %908 = vrot.lane.b32.xlu1 %v830_v25, %s1251_s20 }
 0x20b   : > { %914 = vrot.lane.b32.xlu0 %v836_v17, %s1252_s21 }
 0x20c   : > { %916 = vrot.lane.b32.xlu1 %v837_v20, %s1252_s21  ;;  %v1234_v20 = vld [vmem:[%s1626_s4] ss:$8 sps:$4 sm:$0xff]  }
 0x20f   : > { %918 = vrot.lane.b32.xlu0 %v839_v28, %s1252_s21 }
 0x210   : > { %920 = vrot.lane.b32.xlu1 %v841_v29, %s1252_s21 }
 0x213   : > { %964 = vperm.xlu0 %1228, %v960_v31  }
 0x214   : > { %969 = vperm.xlu1 %1229, %v961_v32  }
 0x24d   : > { %v855_v34 = vpop.permute.xlu0 %854 }
 0x24e   : > { %v857_v35 = vpop.permute.xlu1 %856 }
 0x24f   : > { %v862_v50 = vsel %vm378_vm5, %v855_v34, %v857_v35 }
 0x251   : > { %v843_v36 = vpop.permute.xlu0 %842 }
 0x252   : > { %v845_v37 = vpop.permute.xlu1 %844 }
 0x253   : > { %v850_v38 = vsel %vm366_vm3, %v843_v36, %v845_v37  ;;  %v932_v39 = vsel %vm447_vm1, %v830_v25, %v845_v37 }
 0x254   : > { %986 = vmatprep.subr.bf16.mxu0 %v932_v39  ;;  %v928_v41 = vsel %vm447_vm1, %v829_v23, %v850_v38  ;;  %v1027_v23 = vld [vmem:[%s1628_s6] sm:$0x3] }
 0x255   : > { %v867_v42 = vpop.permute.xlu0 %866  ;;  %987 = vmatpush1.bf16.msra.mxu0 %v928_v41  ;;  %v1032_v28 = vrot.slane %v1027_v23, %v813_v24  ;;  %v1036_v32 = vrot.slane %v1027_v23, %v817_v21 }
 0x256   : > { %v869_v43 = vpop.permute.xlu1 %868 }
 0x257   : > { %v874_v40 = vsel %vm389_vm4, %v867_v42, %v869_v43 }
 0x259   : > { %v859_v44 = vpop.permute.xlu0 %858 }
 0x25a   : > { %v861_v45 = vpop.permute.xlu1 %860 }
 0x25b   : > { %v863_v33 = vsel %vm378_vm5, %v859_v44, %v861_v45  ;;  %v940_v51 = vsel %vm447_vm1, %v861_v45, %v869_v43 }
 0x25c   : > { %v936_v54 = vsel %vm447_vm1, %v863_v33, %v874_v40  ;;  %v1065_v33 = vld [vmem:[%s1629_s7] sm:$0xf] }
 0x25d   : > { %v847_v46 = vpop.permute.xlu0 %846 }
 0x25e   : > { %v849_v47 = vpop.permute.xlu1 %848 }
 0x25f   : > { %988 = vmatprep.subr.bf16.mxu0 %v849_v47  ;;  %v851_v48 = vsel %vm366_vm3, %v847_v46, %v849_v47 }
 0x260   : > { %989 = vmatpush1.bf16.msra.mxu0 %v851_v48 }
 0x261   : > { %v879_v49 = vpop.permute.xlu0 %878  ;;  %990 = vmatprep.subr.bf16.mxu0 %v857_v35 }
 0x262   : > { %v881_v19 = vpop.permute.xlu1 %880 }
 0x263   : > { %v886_v60 = vsel %vm400_vm7, %v879_v49, %v881_v19 }
 0x264   : > { %991 = vmatpush1.bf16.msra.mxu0 %v862_v50 }
 0x265   : > { %v871_v52 = vpop.permute.xlu0 %870  ;;  %992 = vmatprep.subr.bf16.mxu0 %v940_v51 }
 0x266   : > { %v885_v53 = vpop.permute.xlu1 %884 }
 0x268   : > { %993 = vmatpush1.bf16.msra.mxu0 %v936_v54 }
 0x269   : > { %v883_v55 = vpop.permute.xlu0 %882 }
 0x26a   : > { %v873_v56 = vpop.permute.xlu1 %872  ;;  %v887_v0 = vsel %vm400_vm7, %v883_v55, %v885_v53 }
 0x26b   : > { %994 = vmatprep.subr.bf16.mxu0 %v873_v56  ;;  %v875_v57 = vsel %vm389_vm4, %v871_v52, %v873_v56 }
 0x26c   : > { %995 = vmatpush1.bf16.msra.mxu0 %v875_v57 }
 0x26d   : > { %v891_v58 = vpop.permute.xlu0 %890  ;;  %996 = vmatprep.subr.bf16.mxu0 %v881_v19 }
 0x26e   : > { %v893_v59 = vpop.permute.xlu1 %892 }
 0x26f   : > { %v948_v61 = vsel %vm447_vm1, %v885_v53, %v893_v59  ;;  %v898_v62 = vsel %vm411_vm6, %v891_v58, %v893_v59 }
 0x270   : > { %997 = vmatpush1.bf16.msra.mxu0 %v886_v60  ;;  %v944_v2 = vsel %vm447_vm1, %v887_v0, %v898_v62 }
 0x271   : > { %v895_v63 = vpop.permute.xlu0 %894  ;;  %998 = vmatprep.subr.bf16.mxu0 %v948_v61 }
 0x272   : > { %v905_v1 = vpop.permute.xlu1 %904 }
 0x274   : > { %999 = vmatpush1.bf16.msra.mxu0 %v944_v2 }
 0x275   : > { %v903_v4 = vpop.permute.xlu0 %902 }
 0x276   : > { %v897_v5 = vpop.permute.xlu1 %896  ;;  %v910_v9 = vsel %vm422_vm9, %v903_v4, %v905_v1 }
 0x277   : > { %1000 = vmatprep.subr.bf16.mxu0 %v897_v5  ;;  %v899_v6 = vsel %vm411_vm6, %v895_v63, %v897_v5 }
 0x278   : > { %1001 = vmatpush1.bf16.msra.mxu0 %v899_v6 }
 0x279   : > { %v907_v7 = vpop.permute.xlu0 %906  ;;  %1002 = vmatprep.subr.bf16.mxu0 %v905_v1 }
 0x27a   : > { %v909_v8 = vpop.permute.xlu1 %908 }
 0x27b   : > { %v911_v12 = vsel %vm422_vm9, %v907_v7, %v909_v8 }
 0x27c   : > { %1003 = vmatpush1.bf16.msra.mxu0 %v910_v9 }
 0x27d   : > { %v915_v10 = vpop.permute.xlu0 %914 }
 0x27e   : > { %v917_v11 = vpop.permute.xlu1 %916 }
 0x27f   : > { %v922_v13 = vsel %vm433_vm8, %v915_v10, %v917_v11  ;;  %v956_v14 = vsel %vm447_vm1, %v909_v8, %v917_v11 }
 0x280   : > { %1004 = vmatprep.subr.bf16.mxu0 %v956_v14  ;;  %v952_v15 = vsel %vm447_vm1, %v911_v12, %v922_v13 }
 0x281   : > { %v919_v16 = vpop.permute.xlu0 %918  ;;  %1005 = vmatpush1.bf16.msra.mxu0 %v952_v15 }
 0x282   : > { %v921_v17 = vpop.permute.xlu1 %920 }
 0x283   : > { %1006 = vmatprep.subr.bf16.mxu0 %v921_v17  ;;  %v923_v18 = vsel %vm433_vm8, %v919_v16, %v921_v17 }
 0x285   : > { %1007 = vmatpush1.bf16.msra.mxu0 %v923_v18 }
 0x288   : > { %1017 = vmatmul.mubr.bf16.vlgmr.msra.gmra.mrb[0].mxu0 %v1234_v20 }
 0x292   : > { %v965_v25 = vpop.permute.xlu0 %964 }
 0x293   : > { %v970_v30 = vpop.permute.xlu1 %969 }
 0x35b   : > { %v1018_v26 = vpop.f32.mrb[0].mxu0 }
 0x35c   : > { %v1019_v27 = vadd.f32 %v1018_v26, %v965_v25  ;;  %v1020_v29 = vpop.f32.mrb[1].mxu0 }
 0x35d   : > { %v1021_v31 = vadd.f32 %v1020_v29, %v965_v25  ;;  %v1022_v34 = vpop.f32.mrb[2].mxu0 }
 0x35e   : > { %v1023_v35 = vadd.f32 %v1022_v34, %v970_v30  ;;  %v1024_v36 = vpop.f32.mrb[3].mxu0  ;;  %v1039_v38 = vmul.f32 %v1032_v28, %v1019_v27 }
 0x35f   : > { %v1025_v37 = vadd.f32 %v1024_v36, %v970_v30  ;;  %v1040_v41 = vmul.f32 %v1036_v32, %v1021_v31 }
 0x360   : > { %v1041_v39 = vmul.f32 %v1032_v28, %v1023_v35 }
 0x361   : > { %v1042_v42 = vmul.f32 %v1036_v32, %v1025_v37 }
 0x362   : > { %v1043_v43 = vpack.c.bf16 %v1041_v39, %v1039_v38 }
 0x363   : > { %v1044_v44 = vpack.c.bf16 %v1042_v42, %v1040_v41 }
 0x364   : > { %1047 = vrot.lane.b32.xlu0 %v1043_v43, %s1246_s15  ;;  %1197 = vmatpush3.bf16.msra.mxu1 %v1043_v43 }
 0x365   : > { %1049 = vrot.lane.b32.xlu1 %v1044_v44, %s1246_s15  ;;  %1198 = vmatprep.subr.bf16.mxu1 %v1255_v22 }
 0x368   : > { %1053 = vrot.lane.b32.xlu0 %v1043_v43, %s1247_s16 }
 0x369   : > { %1055 = vrot.lane.b32.xlu1 %v1044_v44, %s1247_s16 }
 0x36c   : > { %1059 = vrot.lane.b32.xlu0 %v1043_v43, %s1248_s17 }
 0x36d   : > { %1061 = vrot.lane.b32.xlu1 %v1044_v44, %s1248_s17 }
 0x370   : > { %1069 = vperm.xlu0 %1228, %v1066_v3  }
 0x3d6   : > { %v1048_v24 = vpop.permute.xlu0 %1047 }
 0x3d7   : > { %v1050_v21 = vpop.permute.xlu1 %1049 }
 0x3d8   : > { %v1051_v45 = vsel %vm366_vm3, %v1048_v24, %v1050_v21 }
 0x3d9   : > { %1199 = vmatpush3.bf16.msra.mxu1 %v1051_v45 }
 0x3da   : > { %v1054_v46 = vpop.permute.xlu0 %1053  ;;  %1200 = vmatprep.subr.bf16.mxu1 %v1255_v22 }
 0x3db   : > { %v1056_v47 = vpop.permute.xlu1 %1055 }
 0x3dc   : > { %v1057_v48 = vsel %vm378_vm5, %v1054_v46, %v1056_v47 }
 0x3dd   : > { %1201 = vmatpush3.bf16.msra.mxu1 %v1057_v48 }
 0x3de   : > { %v1060_v49 = vpop.permute.xlu0 %1059  ;;  %1202 = vmatprep.subr.bf16.mxu1 %v1255_v22 }
 0x3df   : > { %v1062_v19 = vpop.permute.xlu1 %1061 }
 0x3e0   : > { %v1063_v50 = vsel %vm389_vm4, %v1060_v49, %v1062_v19 }
 0x3e1   : > { %1203 = vmatpush3.bf16.msra.mxu1 %v1063_v50 }
 0x3e4   : > { %1205 = vmatmul.mubr.msk.bf16.vlgmr.msra.gmra.mrb[16].mxu1 %vm518_vm10, %v1065_v33 }
 0x3ef   : > { %v1070_v51 = vpop.permute.xlu0 %1069 }
 0x4b7   : > { %v1109_v52 = vpop.f32.mrb[16].mxu1 }
 0x4b8   : > { %v1110_v40 = vadd.f32 %v1109_v52, %v1070_v51  ;;  %v1206_v53 = vpop.f32.mrb[17].mxu1 }
 0x4b9   : > { %v1112_v54 = vpop.f32.mrb[18].mxu1 }
 0x4ba   : > { %1115 = vst [vmem:[%s330_s22] sm:$0xff] %v1110_v40  ;;  %v1207_v55 = vpop.f32.mrb[19].mxu1 }
 0x4bb PF: > { %s19_s30 = sadd.s32 1, %s1243_s30  }
 0x4bc   : > { %p16_p4 = scmp.ge.s32.totalorder %s19_s30, 4  }
 0x4be   :  { %18 = sbr.rel (!%p16_p4) target bundleno = 1 (0x1), region = 87 }

</bundles_post_ra>
